<compile_context>
chip_gen: v5e
topology: v5e:2x2
jax: 0.10.0
libtpu: 0.0.40
codegen_flags: <defaults>
</compile_context>

<pallas_src>
import functools

import jax
import jax.numpy as jnp
from jax.experimental import pallas as pl
from jax.experimental.pallas import tpu as pltpu


def _decoder_kernel(*refs, num_sources, apply_act):
    srcs = refs[:num_sources]                       # each (B*T, dim_i)
    wsrc = refs[num_sources:2 * num_sources]        # each (dim_i, H)
    (b_in_ref, w_eff_ref, b_eff_ref, w_fin_ref, b_fin_ref,
     w_hd_ref, b_hd_ref, eps_ref, out_ref) = refs[2 * num_sources:]

    # proj_in with the input concat fused into split weight row-blocks.
    h = jnp.dot(srcs[0][...], wsrc[0][...], preferred_element_type=jnp.float32)
    for s_ref, w_ref in zip(srcs[1:], wsrc[1:]):
        h = h + jnp.dot(s_ref[...], w_ref[...], preferred_element_type=jnp.float32)
    h = h + b_in_ref[...]

    # mlp: shared hidden Linear applied (L-1) times, collapsed to one matmul
    # (W_eff, b_eff built in the wrapper), then ReLU once (idempotent, so one
    # application is bit-identical to (L-1) applications), then final Linear.
    h = jnp.dot(h, w_eff_ref[...], preferred_element_type=jnp.float32) + b_eff_ref[...]
    if apply_act:
        h = jnp.maximum(h, 0.0)
    h = jnp.dot(h, w_fin_ref[...], preferred_element_type=jnp.float32) + b_fin_ref[...]

    # packed heads: [proj_y_mu | proj_y_w] in a single matmul.
    heads = jnp.dot(h, w_hd_ref[...], preferred_element_type=jnp.float32) + b_hd_ref[...]
    y_dim = heads.shape[-1] // 2
    y_mu = heads[:, :y_dim]
    y_w = heads[:, y_dim:]

    # reparameterize: y_std = 0.1 + 0.9 * softplus(y_w); y = y_mu + y_std * eps
    sp = jnp.maximum(y_w, 0.0) + jnp.log(1.0 + jnp.exp(-jnp.abs(y_w)))  # stable softplus
    y_std = 0.1 + 0.9 * sp
    y = y_mu + y_std * eps_ref[...]

    # single packed output buffer: [y | y_mu | y_std]
    out_ref[:, :y_dim] = y
    out_ref[:, y_dim:2 * y_dim] = y_mu
    out_ref[:, 2 * y_dim:] = y_std


def decoder_forward(x_target, r, z, params, eps, *, num_layers,
                    non_linearity="ReLU", has_latent_path=True,
                    has_deterministic_path=True):
    assert non_linearity == "ReLU"  # TODO(synk): other nn activations would need a branch here
    x_target = x_target.astype(jnp.float32)
    B, T, x_dim = x_target.shape
    BT = B * T

    w_in = params["w_in"].astype(jnp.float32)

    # proj_in inputs + split W_in row-blocks, in the torch concat order
    # ([x, r, z] / [x, z] / [x, r] depending on which paths exist).
    sources = [x_target.reshape(BT, x_dim)]
    w_blocks = [w_in[:x_dim]]
    off = x_dim
    if has_deterministic_path:
        r_dim = r.shape[-1]
        sources.append(r.astype(jnp.float32).reshape(BT, r_dim))
        w_blocks.append(w_in[off:off + r_dim])
        off += r_dim
    if has_latent_path:
        z_dim = z.shape[-1]
        z_rep = jnp.broadcast_to(z.astype(jnp.float32)[:, None, :], (B, T, z_dim))
        sources.append(z_rep.reshape(BT, z_dim))          # torch's unsqueeze+repeat
        w_blocks.append(w_in[off:off + z_dim])
        off += z_dim
    assert off == w_in.shape[0]

    # Collapse the repeated shared hidden Linear (applied num_layers-1 times):
    #   h W^(L-1) + b (I + W + ... + W^(L-2))
    H = params["w_mid"].shape[0]
    w_eff = jnp.eye(H, dtype=jnp.float32)
    b_eff = jnp.zeros((1, H), jnp.float32)
    for _ in range(num_layers - 1):
        b_eff = b_eff @ params["w_mid"] + params["b_mid"]
        w_eff = w_eff @ params["w_mid"]

    # Pack the two heads into one matmul.
    w_heads = jnp.concatenate([params["w_mu"], params["w_w"]], axis=1)
    b_heads = jnp.concatenate([params["b_mu"], params["b_w"]], axis=1)
    y_dim = params["w_mu"].shape[1]

    eps2 = eps.astype(jnp.float32).reshape(BT, y_dim)

    inputs = (*sources, *w_blocks, params["b_in"].astype(jnp.float32),
              w_eff, b_eff,
              params["w_fin"].astype(jnp.float32), params["b_fin"].astype(jnp.float32),
              w_heads, b_heads, eps2)

    kernel = functools.partial(_decoder_kernel,
                               num_sources=len(sources),
                               apply_act=num_layers > 1)
    vmem = pl.BlockSpec(memory_space=pltpu.MemorySpace.VMEM)
    packed = pl.pallas_call(
        kernel,
        out_shape=jax.ShapeDtypeStruct((BT, 3 * y_dim), jnp.float32),
        in_specs=[vmem] * len(inputs),
        out_specs=vmem,
    )(*inputs)

    packed = packed.reshape(B, T, 3 * y_dim)
    y = packed[..., :y_dim]
    y_mu = packed[..., y_dim:2 * y_dim]
    y_std = packed[..., 2 * y_dim:]
    return y, y_mu, y_std


def reference_forward(x_target, r, z, params, eps, *, num_layers,
                      has_latent_path=True, has_deterministic_path=True):
    """Pure-JAX reference matching the PyTorch module exactly."""
    B, T, _ = x_target.shape
    if has_latent_path:
        z_rep = jnp.broadcast_to(z[:, None, :], (B, T, z.shape[-1]))
    if has_latent_path and has_deterministic_path:
        h = jnp.concatenate([x_target, r, z_rep], axis=-1)
    elif has_latent_path:
        h = jnp.concatenate([x_target, z_rep], axis=-1)
    else:
        h = jnp.concatenate([x_target, r], axis=-1)
    h = h @ params["w_in"] + params["b_in"][0]
    for _ in range(num_layers - 1):            # same Linear repeated (module "bug")
        h = h @ params["w_mid"] + params["b_mid"][0]
    for _ in range(num_layers - 1):            # activation repeated
        h = jax.nn.relu(h)
    h = h @ params["w_fin"] + params["b_fin"][0]
    y_mu = h @ params["w_mu"] + params["b_mu"][0]
    y_w = h @ params["w_w"] + params["b_w"][0]
    y_std = 0.1 + 0.9 * jax.nn.softplus(y_w)
    y = y_mu + y_std * eps
    return y, y_mu, y_std


def _init_linear(key, fan_in, fan_out):
    """PyTorch-style init: U(-1/sqrt(fan_in), 1/sqrt(fan_in))."""
    kw, kb = jax.random.split(key)
    bound = 1.0 / (fan_in ** 0.5)
    w = jax.random.uniform(kw, (fan_in, fan_out), jnp.float32, -bound, bound)
    b = jax.random.uniform(kb, (1, fan_out), jnp.float32, -bound, bound)
    return w, b


if __name__ == "__main__":
    # Small shapes consistent with the module's forward (full latent+det path).
    x_dim, r_dim, z_dim, h_dim, y_dim = 3, 16, 16, 32, 2
    num_layers = 3
    B, T = 2, 8

    key = jax.random.PRNGKey(0)
    (k_in, k_mid, k_fin, k_mu, k_w, k_x, k_r, k_z, k_eps) = jax.random.split(key, 9)

    w_in, b_in = _init_linear(k_in, x_dim + r_dim + z_dim, h_dim)
    w_mid, b_mid = _init_linear(k_mid, h_dim, h_dim)   # the single shared mlp Linear
    w_fin, b_fin = _init_linear(k_fin, h_dim, h_dim)   # final mlp Linear
    w_mu, b_mu = _init_linear(k_mu, h_dim, y_dim)
    w_w, b_w = _init_linear(k_w, h_dim, y_dim)
    params = dict(w_in=w_in, b_in=b_in, w_mid=w_mid, b_mid=b_mid,
                  w_fin=w_fin, b_fin=b_fin, w_mu=w_mu, b_mu=b_mu,
                  w_w=w_w, b_w=b_w)

    x_target = jax.random.normal(k_x, (B, T, x_dim), jnp.float32)
    r = jax.random.normal(k_r, (B, T, r_dim), jnp.float32)
    z = jax.random.normal(k_z, (B, z_dim), jnp.float32)
    eps = jax.random.normal(k_eps, (B, T, y_dim), jnp.float32)   # torch.randn_like(y_std)

    y, y_mu, y_std = decoder_forward(
        x_target, r, z, params, eps, num_layers=num_layers,
        has_latent_path=True, has_deterministic_path=True)
    jax.block_until_ready((y, y_mu, y_std))

    y_r, y_mu_r, y_std_r = reference_forward(
        x_target, r, z, params, eps, num_layers=num_layers,
        has_latent_path=True, has_deterministic_path=True)

    for a, b, name in [(y, y_r, "y"), (y_mu, y_mu_r, "y_mu"), (y_std, y_std_r, "y_std")]:
        err = float(jnp.max(jnp.abs(a - b)))
        if err > 2e-2:
            raise AssertionError(f"{name} mismatch: max abs err {err}")

    print("KERNEL_OK")
</pallas_src>

<mosaic_0001>
module attributes {stable_mosaic.version = 11 : i64} {
  func.func @_decoder_kernel(%arg0: memref<16x3xf32, #tpu.memory_space<vmem>>, %arg1: memref<16x16xf32, #tpu.memory_space<vmem>>, %arg2: memref<16x16xf32, #tpu.memory_space<vmem>>, %arg3: memref<3x32xf32, #tpu.memory_space<vmem>>, %arg4: memref<16x32xf32, #tpu.memory_space<vmem>>, %arg5: memref<16x32xf32, #tpu.memory_space<vmem>>, %arg6: memref<1x32xf32, #tpu.memory_space<vmem>>, %arg7: memref<32x32xf32, #tpu.memory_space<vmem>>, %arg8: memref<1x32xf32, #tpu.memory_space<vmem>>, %arg9: memref<32x32xf32, #tpu.memory_space<vmem>>, %arg10: memref<1x32xf32, #tpu.memory_space<vmem>>, %arg11: memref<32x4xf32, #tpu.memory_space<vmem>>, %arg12: memref<1x4xf32, #tpu.memory_space<vmem>>, %arg13: memref<16x2xf32, #tpu.memory_space<vmem>>, %arg14: memref<16x6xf32, #tpu.memory_space<vmem>>) attributes {dimension_semantics = [], scalar_prefetch = 0 : i64, scratch_operands = 0 : i64, tpu.core_type = #tpu.core_type<tc>} {
    %c0 = arith.constant 0 : index
    %c0_0 = arith.constant 0 : index
    %0 = vector.load %arg0[%c0, %c0_0] : memref<16x3xf32, #tpu.memory_space<vmem>>, vector<16x3xf32>
    %c0_1 = arith.constant 0 : index
    %c0_2 = arith.constant 0 : index
    %1 = vector.load %arg3[%c0_1, %c0_2] : memref<3x32xf32, #tpu.memory_space<vmem>>, vector<3x32xf32>
    %cst = arith.constant dense<0.000000e+00> : vector<16x32xf32>
    %2 = tpu.matmul %0, %1, %cst {dimension_numbers = #tpu.dot_dimension_numbers<[1], [0], [0], [1], [0, 0, 1, 1], [], []>} : vector<16x3xf32>, vector<3x32xf32>, vector<16x32xf32> -> vector<16x32xf32>
    %c0_3 = arith.constant 0 : index
    %c0_4 = arith.constant 0 : index
    %3 = vector.load %arg1[%c0_3, %c0_4] : memref<16x16xf32, #tpu.memory_space<vmem>>, vector<16x16xf32>
    %c0_5 = arith.constant 0 : index
    %c0_6 = arith.constant 0 : index
    %4 = vector.load %arg4[%c0_5, %c0_6] : memref<16x32xf32, #tpu.memory_space<vmem>>, vector<16x32xf32>
    %cst_7 = arith.constant dense<0.000000e+00> : vector<16x32xf32>
    %5 = tpu.matmul %3, %4, %cst_7 {dimension_numbers = #tpu.dot_dimension_numbers<[1], [0], [0], [1], [0, 0, 1, 1], [], []>} : vector<16x16xf32>, vector<16x32xf32>, vector<16x32xf32> -> vector<16x32xf32>
    %6 = arith.addf %2, %5 : vector<16x32xf32>
    %c0_8 = arith.constant 0 : index
    %c0_9 = arith.constant 0 : index
    %7 = vector.load %arg2[%c0_8, %c0_9] : memref<16x16xf32, #tpu.memory_space<vmem>>, vector<16x16xf32>
    %c0_10 = arith.constant 0 : index
    %c0_11 = arith.constant 0 : index
    %8 = vector.load %arg5[%c0_10, %c0_11] : memref<16x32xf32, #tpu.memory_space<vmem>>, vector<16x32xf32>
    %cst_12 = arith.constant dense<0.000000e+00> : vector<16x32xf32>
    %9 = tpu.matmul %7, %8, %cst_12 {dimension_numbers = #tpu.dot_dimension_numbers<[1], [0], [0], [1], [0, 0, 1, 1], [], []>} : vector<16x16xf32>, vector<16x32xf32>, vector<16x32xf32> -> vector<16x32xf32>
    %10 = arith.addf %6, %9 : vector<16x32xf32>
    %c0_13 = arith.constant 0 : index
    %c0_14 = arith.constant 0 : index
    %11 = vector.load %arg6[%c0_13, %c0_14] : memref<1x32xf32, #tpu.memory_space<vmem>>, vector<1x32xf32>
    %12 = vector.broadcast %11 : vector<1x32xf32> to vector<16x32xf32>
    %13 = arith.addf %10, %12 : vector<16x32xf32>
    %c0_15 = arith.constant 0 : index
    %c0_16 = arith.constant 0 : index
    %14 = vector.load %arg7[%c0_15, %c0_16] : memref<32x32xf32, #tpu.memory_space<vmem>>, vector<32x32xf32>
    %cst_17 = arith.constant dense<0.000000e+00> : vector<16x32xf32>
    %15 = tpu.matmul %13, %14, %cst_17 {dimension_numbers = #tpu.dot_dimension_numbers<[1], [0], [0], [1], [0, 0, 1, 1], [], []>} : vector<16x32xf32>, vector<32x32xf32>, vector<16x32xf32> -> vector<16x32xf32>
    %c0_18 = arith.constant 0 : index
    %c0_19 = arith.constant 0 : index
    %16 = vector.load %arg8[%c0_18, %c0_19] : memref<1x32xf32, #tpu.memory_space<vmem>>, vector<1x32xf32>
    %17 = vector.broadcast %16 : vector<1x32xf32> to vector<16x32xf32>
    %18 = arith.addf %15, %17 : vector<16x32xf32>
    %cst_20 = arith.constant 0.000000e+00 : f32
    %19 = vector.broadcast %cst_20 : f32 to vector<16x32xf32>
    %20 = arith.maximumf %18, %19 : vector<16x32xf32>
    %c0_21 = arith.constant 0 : index
    %c0_22 = arith.constant 0 : index
    %21 = vector.load %arg9[%c0_21, %c0_22] : memref<32x32xf32, #tpu.memory_space<vmem>>, vector<32x32xf32>
    %cst_23 = arith.constant dense<0.000000e+00> : vector<16x32xf32>
    %22 = tpu.matmul %20, %21, %cst_23 {dimension_numbers = #tpu.dot_dimension_numbers<[1], [0], [0], [1], [0, 0, 1, 1], [], []>} : vector<16x32xf32>, vector<32x32xf32>, vector<16x32xf32> -> vector<16x32xf32>
    %c0_24 = arith.constant 0 : index
    %c0_25 = arith.constant 0 : index
    %23 = vector.load %arg10[%c0_24, %c0_25] : memref<1x32xf32, #tpu.memory_space<vmem>>, vector<1x32xf32>
    %24 = vector.broadcast %23 : vector<1x32xf32> to vector<16x32xf32>
    %25 = arith.addf %22, %24 : vector<16x32xf32>
    %c0_26 = arith.constant 0 : index
    %c0_27 = arith.constant 0 : index
    %26 = vector.load %arg11[%c0_26, %c0_27] : memref<32x4xf32, #tpu.memory_space<vmem>>, vector<32x4xf32>
    %cst_28 = arith.constant dense<0.000000e+00> : vector<16x4xf32>
    %27 = tpu.matmul %25, %26, %cst_28 {dimension_numbers = #tpu.dot_dimension_numbers<[1], [0], [0], [1], [0, 0, 1, 1], [], []>} : vector<16x32xf32>, vector<32x4xf32>, vector<16x4xf32> -> vector<16x4xf32>
    %c0_29 = arith.constant 0 : index
    %c0_30 = arith.constant 0 : index
    %28 = vector.load %arg12[%c0_29, %c0_30] : memref<1x4xf32, #tpu.memory_space<vmem>>, vector<1x4xf32>
    %29 = vector.broadcast %28 : vector<1x4xf32> to vector<16x4xf32>
    %30 = arith.addf %27, %29 : vector<16x4xf32>
    %31 = vector.extract_strided_slice %30 {offsets = [0, 0], sizes = [16, 2], strides = [1, 1]} : vector<16x4xf32> to vector<16x2xf32>
    %32 = vector.extract_strided_slice %30 {offsets = [0, 2], sizes = [16, 2], strides = [1, 1]} : vector<16x4xf32> to vector<16x2xf32>
    %cst_31 = arith.constant 0.000000e+00 : f32
    %33 = vector.broadcast %cst_31 : f32 to vector<16x2xf32>
    %34 = arith.maximumf %32, %33 : vector<16x2xf32>
    %35 = math.absf %32 : vector<16x2xf32>
    %cst_32 = arith.constant 0.000000e+00 : f32
    %36 = vector.broadcast %cst_32 : f32 to vector<16x2xf32>
    %37 = arith.subf %36, %35 : vector<16x2xf32>
    %38 = math.exp %37 : vector<16x2xf32>
    %cst_33 = arith.constant 1.000000e+00 : f32
    %39 = vector.broadcast %cst_33 : f32 to vector<16x2xf32>
    %40 = arith.addf %39, %38 : vector<16x2xf32>
    %41 = math.log %40 : vector<16x2xf32>
    %42 = arith.addf %34, %41 : vector<16x2xf32>
    %cst_34 = arith.constant 0.899999976 : f32
    %43 = vector.broadcast %cst_34 : f32 to vector<16x2xf32>
    %44 = arith.mulf %43, %42 : vector<16x2xf32>
    %cst_35 = arith.constant 1.000000e-01 : f32
    %45 = vector.broadcast %cst_35 : f32 to vector<16x2xf32>
    %46 = arith.addf %45, %44 : vector<16x2xf32>
    %c0_36 = arith.constant 0 : index
    %c0_37 = arith.constant 0 : index
    %47 = vector.load %arg13[%c0_36, %c0_37] : memref<16x2xf32, #tpu.memory_space<vmem>>, vector<16x2xf32>
    %48 = arith.mulf %46, %47 : vector<16x2xf32>
    %49 = arith.addf %31, %48 : vector<16x2xf32>
    %c0_38 = arith.constant 0 : index
    %c0_39 = arith.constant 0 : index
    %50 = vector.load %arg14[%c0_38, %c0_39] : memref<16x6xf32, #tpu.memory_space<vmem>>, vector<16x2xf32>
    tpu.vector_store %arg14[%c0_38, %c0_39], %49 {strides = array<i32>} : memref<16x6xf32, #tpu.memory_space<vmem>>, vector<16x2xf32>,
    %c0_40 = arith.constant 0 : index
    %c2 = arith.constant 2 : index
    %51 = vector.load %arg14[%c0_40, %c2] : memref<16x6xf32, #tpu.memory_space<vmem>>, vector<16x2xf32>
    tpu.vector_store %arg14[%c0_40, %c2], %31 {strides = array<i32>} : memref<16x6xf32, #tpu.memory_space<vmem>>, vector<16x2xf32>,
    %c0_41 = arith.constant 0 : index
    %c4 = arith.constant 4 : index
    %52 = vector.load %arg14[%c0_41, %c4] : memref<16x6xf32, #tpu.memory_space<vmem>>, vector<16x2xf32>
    tpu.vector_store %arg14[%c0_41, %c4], %46 {strides = array<i32>} : memref<16x6xf32, #tpu.memory_space<vmem>>, vector<16x2xf32>,
    return
  }
}

</mosaic_0001>

<bundles_post_ra>
// kernel: tpu_custom_call.1
= control target key start
LH: loop header
LB: loop body
LE: loop exit
PB: predicated region body
PF: predicated region fallthrough
CT: control target
= control target key end

     0   :  { %19 = vsyncpa [#allocation3], 0  ;;  %s746_s0 = inlined_call_operand.vmem [shape: f32[16,3], index: 0, kind: input, shape index: {}]   ;;  %s747_s1 = inlined_call_operand.hbm [shape: f32[16,16], index: 1, kind: input, shape index: {}]   ;;  %s748_s2 = inlined_call_operand.hbm [shape: f32[16,16], index: 2, kind: input, shape index: {}]   ;;  %s749_s3 = inlined_call_operand.vmem [shape: f32[3,32], index: 3, kind: input, shape index: {}]   ;;  %s750_s4 = inlined_call_operand.hbm [shape: f32[16,32], index: 4, kind: input, shape index: {}]   ;;  %s751_s5 = inlined_call_operand.hbm [shape: f32[16,32], index: 5, kind: input, shape index: {}]   ;;  %s752_s6 = inlined_call_operand.vmem [shape: f32[1,32], index: 6, kind: input, shape index: {}]   ;;  %s753_s7 = inlined_call_operand.vmem [shape: f32[32,32], index: 7, kind: input, shape index: {}]   ;;  %s754_s8 = inlined_call_operand.vmem [shape: f32[1,32], index: 8, kind: input, shape index: {}]   ;;  %s755_s9 = inlined_call_operand.vmem [shape: f32[32,32], index: 9, kind: input, shape index: {}]   ;;  %s756_s10 = inlined_call_operand.vmem [shape: f32[1,32], index: 10, kind: input, shape index: {}]   ;;  %s757_s11 = inlined_call_operand.vmem [shape: f32[32,4], index: 11, kind: input, shape index: {}]   ;;  %s758_s12 = inlined_call_operand.vmem [shape: f32[1,4], index: 12, kind: input, shape index: {}]   ;;  %s759_s13 = inlined_call_operand.vmem [shape: f32[16,2], index: 13, kind: input, shape index: {}]   ;;  %s760_s14 = inlined_call_operand.vmem [shape: f32[16,6], index: 14, kind: output, shape index: {}]  }
   0x1   :  { %20 = vsyncpa [#allocation5], 0 }
   0x2   :  { %21 = vsyncpa [#allocation8], 0  ;;  %s41_s15 = sshll.u32 %s748_s2, 4  ;;  %s550_s16 = smov [#allocation4]   ;;  %s42_s15 = int_to_ptr.hbm [resolvable:$true] %s41_s15 }
   0x3   :  { %s43_s17 = sshll.u32 %s550_s16, 4  ;;  %s28_s20 = sshll.u32 %s747_s1, 4  ;;  %s44_s17 = int_to_ptr.vmem [resolvable:$true] %s43_s17  ;;  %s29_s20 = int_to_ptr.hbm [resolvable:$true] %s28_s20 }
   0x4   :  { %s551_s21 = smov 128   ;;  %s552_s22 = smov 8  }
   0x5   :  { %49 = dma.hbm_to_vmem [thread:$0]  %s42_s15, 256, %s44_s17, [#allocation5], %s551_s21, %s551_s21, %s552_s22  }
   0x6   :  { %s553_s23 = smov [#allocation2]   ;;  %s56_s27 = sshll.u32 %s750_s4, 4  ;;  %s57_s27 = int_to_ptr.hbm [resolvable:$true] %s56_s27 }
   0x7   :  { %s30_s24 = sshll.u32 %s553_s23, 4  ;;  %s69_s29 = sshll.u32 %s751_s5, 4  ;;  %s31_s24 = int_to_ptr.vmem [resolvable:$true] %s30_s24  ;;  %s70_s29 = int_to_ptr.hbm [resolvable:$true] %s69_s29 }
   0x8   :  { %36 = dma.hbm_to_vmem [thread:$0]  %s29_s20, 256, %s31_s24, [#allocation3], %s551_s21, %s551_s21, %s552_s22  }
   0x9   :  { %s554_s30 = smov [#allocation6]   ;;  %s555_s1 = smov [#allocation7]  }
   0xa   :  { %s58_s16 = sshll.u32 %s554_s30, 4  ;;  %s71_s15 = sshll.u32 %s555_s1, 4  ;;  %s59_s16 = int_to_ptr.vmem [resolvable:$true] %s58_s16  ;;  %s72_s15 = int_to_ptr.vmem [resolvable:$true] %s71_s15 }
   0xb   :  { %64 = dma.hbm_to_vmem [thread:$0]  %s57_s27, 256, %s59_s16, [#allocation5], %s551_s21, %s551_s21, %s552_s22  }
   0xc   :  { %77 = dma.hbm_to_vmem [thread:$0]  %s70_s29, 256, %s72_s15, [#allocation8], %s551_s21, %s551_s21, %s552_s22  }
   0xd   :  { %544 = dma.done.wait [#allocation3], 256  }
   0xe   :  { %545 = vsyncadd [#allocation3], 4294967040 }
   0xf   :  { %546 = dma.done.wait [#allocation5], 512  }
  0x10   :  { %547 = vsyncadd [#allocation5], 4294966784 }
  0x11   :  { %548 = dma.done.wait [#allocation8], 256  }
  0x12   :  { %549 = vsyncadd [#allocation8], 4294967040  ;;  %vm154_vm0 = vcmask 1042432   ;;  %vm147_vm1 = vcmask 23552   ;;  %v116_v0 = vld [vmem:[#allocation6 + $0x8] sm:$0xff]  ;;  %v115_v1 = vld [vmem:[#allocation6] sm:$0xff] }
  0x13   :  { %v112_v2 = vld [vmem:[%s749_s3] sm:$0x7]  ;;  %425 = vmatpush.msra.mxu2 %v116_v0  ;;  %v114_v3 = vld [vmem:[#allocation2 + $0x8] sm:$0xff]  ;;  %vm117_vm2 = vcmask 130048   ;;  %v184_v5 = vld [vmem:[#allocation7 + $0x8] sm:$0xff]  ;;  %138 = vmatpush.msra.mxu0 %v116_v0  ;;  %vm230_vm3 = vcmask 261120  }
  0x14   :  { %427 = vmatpush.msk.msra.mxu3 %vm154_vm0, %v112_v2  ;;  %v111_v4 = vld [vmem:[%s746_s0 + $0x8] sm:$0xff]  ;;  %v113_v6 = vld [vmem:[#allocation2] sm:$0xff]  ;;  %v183_v7 = vld [vmem:[#allocation7] sm:$0xff]  ;;  %414 = vmatpush.msk.msra.mxu1 %vm154_vm0, %v112_v2  ;;  %vm380_vm4 = vcmask 15360   ;;  %vm391_vm5 = vcmask 31760   ;;  %vm402_vm6 = vcmask 48160  }
  0x15   :  { %416 = vmatmul.msk.f32.vlgmr.msra.gmra.mxu3 %vm147_vm1, %v111_v4  ;;  %426 = vmatpush.msra.mxu2 %v115_v1  ;;  %v110_v8 = vld [vmem:[%s746_s0] sm:$0xff]  ;;  %v181_v9 = vld [vmem:[#allocation4] sm:$0xff]  ;;  %v182_v10 = vld [vmem:[#allocation4 + $0x8] sm:$0xff] }
  0x16   :  { %413 = vmatmul.msk.f32.vlgmr.msra.gmra.mxu2 %vm117_vm2, %v114_v3  ;;  %139 = vmatpush.msra.mxu0 %v115_v1  ;;  %v225_v11 = vld [vmem:[%s753_s7 + $0x18] sm:$0xff]  ;;  %v224_v12 = vld [vmem:[%s753_s7 + $0x10] sm:$0xff]  ;;  %v223_v13 = vld [vmem:[%s753_s7 + $0x8] sm:$0xff] }
  0x17   :  { %205 = vmatpush.msrb.mxu2 %v184_v5  ;;  %412 = vmatmul.msk.f32.vlgmr.msra.gmra.mxu0 %vm117_vm2, %v113_v6  ;;  %v222_v14 = vld [vmem:[%s753_s7] sm:$0xff]  ;;  %v265_v15 = vld [vmem:[%s755_s9 + $0x18] sm:$0xff]  ;;  %v264_v16 = vld [vmem:[%s755_s9 + $0x10] sm:$0xff] }
  0x18   :  { %415 = vmatmul.msk.f32.vlgmr.msra.gmra.mxu1 %vm147_vm1, %v110_v8  ;;  %249 = vmatpush.msrb.mxu3 %v225_v11  ;;  %v436_v21 = vld [vmem:[%s752_s6] ss:$0 sm:$0xff]  ;;  %v263_v30 = vld [vmem:[%s755_s9 + $0x8] sm:$0xff]  ;;  %v302_v32 = vld [vmem:[%s757_s11 + $0x18] sm:$0xff] }
  0x19   :  { %206 = vmatpush.msrb.mxu2 %v183_v7  ;;  %288 = vmatpush.msrb.mxu1 %v265_v15  ;;  %v262_v31 = vld [vmem:[%s755_s9] sm:$0xff]  ;;  %v301_v33 = vld [vmem:[%s757_s11 + $0x10] sm:$0xff]  ;;  %v300_v34 = vld [vmem:[%s757_s11 + $0x8] sm:$0xff] }
  0x1a   :  { %250 = vmatpush.msrb.mxu3 %v224_v12  ;;  %325 = vmatpush.msrb.mxu0 %v302_v32  ;;  %v437_v35 = vld [vmem:[%s754_s8] ss:$0 sm:$0xff]  ;;  %s556_s8 = smov 2   ;;  %v359_v44 = vld [vmem:[%s759_s13 + $0x8] sm:$0xff] }
  0x1b   :  { %289 = vmatpush.msrb.mxu1 %v264_v16  ;;  %v299_v42 = vld [vmem:[%s757_s11] sm:$0xff] }
  0x1c   :  { %251 = vmatpush.msrb.mxu3 %v223_v13  ;;  %326 = vmatpush.msrb.mxu0 %v301_v33  ;;  %v358_v43 = vld [vmem:[%s759_s13] sm:$0xff] }
  0x1d   :  { %290 = vmatpush.msrb.mxu1 %v263_v30  ;;  %362 = vrot.lane.b32.xlu0 %v358_v43, %s556_s8  ;;  %v438_v45 = vld [vmem:[%s756_s10] ss:$0 sm:$0xff]  ;;  %s557_s10 = smov 126  }
  0x1e   :  { %417 = vmatmul.msk.f32.vlgmr.msrb.gmra.mxu2 %vm117_vm2, %v181_v9  ;;  %252 = vmatpush.msrb.mxu3 %v222_v14  ;;  %v439_v50 = vld [vmem:[%s758_s12] ss:$0 sm:$0xff] }
  0x1f   :  { %291 = vmatpush.msrb.mxu1 %v262_v31  ;;  %327 = vmatpush.msrb.mxu0 %v300_v34 }
  0x21   :  { %328 = vmatpush.msrb.mxu0 %v299_v42 }
  0x25   :  { %364 = vrot.lane.b32.xlu0 %v359_v44, %s556_s8 }
  0x26   :  { %418 = vmatmul.msk.f32.gmra.mxu2 %vm117_vm2, %v182_v10 }
  0x8f   :  { %v363_v5 = vpop.permute.xlu0 %362 }
  0x94   :  { %v141_v18 = vpop.f32.mrf.mxu0 }
  0x95   :  { %v175_v19 = vpop.f32.mrf.mxu1 }
  0x96   :  { %v176_v20 = vadd.f32 %v175_v19, %v141_v18 }
  0x97   :  { %v365_v14 = vpop.permute.xlu0 %364 }
  0x98   :  { %v178_v25 = vpop.f32.mrf.mxu3 }
  0x99   :  { %v144_v17 = vpop.f32.mrf.mxu2 }
  0x9a   :  { %v179_v26 = vadd.f32 %v178_v25, %v144_v17 }
  0xa1   :  { %v208_v22 = vpop.f32.mrf.mxu2 }
  0xa2   :  { %v214_v23 = vadd.f32 %v208_v22, %v176_v20 }
  0xa4   :  { %v220_v24 = vadd.f32 %v436_v21, %v214_v23 }
  0xa6   :  { %419 = vmatmul.msk.f32.vlgmr.msrb.gmra.mxu3 %vm230_vm3, %v220_v24 }
  0xa9   :  { %v211_v27 = vpop.f32.mrf.mxu2 }
  0xaa   :  { %v215_v28 = vadd.f32 %v211_v27, %v179_v26 }
  0xac   :  { %v221_v29 = vadd.f32 %v436_v21, %v215_v28 }
  0xae   :  { %420 = vmatmul.msk.f32.gmra.mxu3 %vm230_vm3, %v221_v29 }
 0x129   :  { %v254_v36 = vpop.f32.mrf.mxu3 }
 0x12a   :  { %v255_v37 = vadd.f32 %v437_v35, %v254_v36 }
 0x12c   :  { %v260_v38 = vmax.f32 %v255_v37, 0.0 }
 0x12e   :  { %421 = vmatmul.msk.f32.vlgmr.msrb.gmra.mxu1 %vm230_vm3, %v260_v38 }
 0x131   :  { %v257_v39 = vpop.f32.mrf.mxu3 }
 0x132   :  { %v258_v40 = vadd.f32 %v437_v35, %v257_v39 }
 0x134   :  { %v261_v41 = vmax.f32 %v258_v40, 0.0 }
 0x136   :  { %422 = vmatmul.msk.f32.gmra.mxu1 %vm230_vm3, %v261_v41 }
 0x1ab   :  { %v293_v46 = vpop.f32.mrf.mxu1 }
 0x1ac   :  { %v294_v47 = vadd.f32 %v438_v45, %v293_v46 }
 0x1ae   :  { %423 = vmatmul.msk.f32.vlgmr.msrb.gmra.mxu0 %vm230_vm3, %v294_v47 }
 0x1b3   :  { %v296_v48 = vpop.f32.mrf.mxu1 }
 0x1b4   :  { %v297_v49 = vadd.f32 %v438_v45, %v296_v48 }
 0x1b6   :  { %424 = vmatmul.msk.f32.gmra.mxu0 %vm230_vm3, %v297_v49 }
 0x22b   :  { %v330_v51 = vpop.f32.mrf.mxu0 }
 0x22c   :  { %v331_v52 = vadd.f32 %v439_v50, %v330_v51 }
 0x22e   :  { %v338_v53 = vand.u32 2147483647, %v331_v52  ;;  %385 = vrot.lane.b32.xlu2 %v331_v52, %s556_s8  ;;  %v336_v2 = vmax.f32 %v331_v52, 0.0 }
 0x230   :  { %v340_v54 = vsub.f32 0.0, %v338_v53 }
 0x232   :  { %v342_v55 = vmul.f32 1.442695, %v340_v54 }
 0x233   :  { %v333_v56 = vpop.f32.mrf.mxu0 }
 0x234   :  { %v334_v57 = vadd.f32 %v439_v50, %v333_v56  ;;  %440 = vpow2.f32 %v342_v55 }
 0x236   :  { %v339_v58 = vand.u32 2147483647, %v334_v57  ;;  %387 = vrot.lane.b32.xlu2 %v334_v57, %s556_s8  ;;  %v337_v10 = vmax.f32 %v334_v57, 0.0 }
 0x238   :  { %v341_v59 = vsub.f32 0.0, %v339_v58 }
 0x23a   :  { %v441_v60 = vpop.eup %440  ;;  %v344_v61 = vmul.f32 1.442695, %v341_v59 }
 0x23b   :  { %v346_v62 = vadd.f32 1.0, %v441_v60 }
 0x23c   :  { %442 = vpow2.f32 %v344_v61 }
 0x23d   :  { %444 = vlog2.f32 %v346_v62 }
 0x242   :  { %v443_v63 = vpop.eup %442 }
 0x243   :  { %v445_v0 = vpop.eup %444  ;;  %v347_v1 = vadd.f32 1.0, %v443_v63 }
 0x244   :  { %v349_v3 = vmul.f32 0.6931472, %v445_v0 }
 0x245   :  { %446 = vlog2.f32 %v347_v1 }
 0x246   :  { %v352_v4 = vadd.f32 %v349_v3, %v336_v2 }
 0x248   :  { %v354_v6 = vmul.f32 0.9, %v352_v4 }
 0x24a   :  { %v356_v7 = vadd.f32 0.1, %v354_v6 }
 0x24b   :  { %v447_v8 = vpop.eup %446 }
 0x24c   :  { %v368_v9 = vmul.f32 %v363_v5, %v356_v7  ;;  %396 = vrot.lane.b32.xlu0 %v356_v7, %s556_s8  ;;  %v351_v11 = vmul.f32 0.6931472, %v447_v8 }
 0x24e   :  { %372 = vrot.lane.b32.xlu1 %v368_v9, %s557_s10  ;;  %v353_v12 = vadd.f32 %v351_v11, %v337_v10 }
 0x250   :  { %v355_v13 = vmul.f32 0.9, %v353_v12 }
 0x252   :  { %v357_v15 = vadd.f32 0.1, %v355_v13 }
 0x254   :  { %v369_v16 = vmul.f32 %v365_v14, %v357_v15 }
 0x256   :  { %374 = vrot.lane.b32.xlu1 %v369_v16, %s557_s10 }
 0x25e   :  { %398 = vrot.lane.b32.xlu1 %v357_v15, %s556_s8 }
 0x288   :  { %v386_v18 = vpop.permute.xlu2 %385 }
 0x290   :  { %v388_v23 = vpop.permute.xlu2 %387 }
 0x2be   :  { %v397_v20 = vpop.permute.xlu0 %396 }
 0x2c0   :  { %v373_v17 = vpop.permute.xlu1 %372 }
 0x2c1   :  { %v378_v19 = vadd.f32 %v373_v17, %v331_v52 }
 0x2c3   :  { %381 = vst.msk [vmem:[%s760_s14] sm:$0xff] %vm380_vm4, %v378_v19 }
 0x2c4   :  { %392 = vst.msk [vmem:[%s760_s14] sm:$0xff] %vm391_vm5, %v386_v18 }
 0x2c5   :  { %403 = vst.msk [vmem:[%s760_s14] sm:$0xff] %vm402_vm6, %v397_v20 }
 0x2c8   :  { %v375_v21 = vpop.permute.xlu1 %374 }
 0x2c9   :  { %v379_v22 = vadd.f32 %v375_v21, %v334_v57 }
 0x2cb   :  { %382 = vst.msk [vmem:[%s760_s14 + $0x8] sm:$0xff] %vm380_vm4, %v379_v22 }
 0x2cc   :  { %393 = vst.msk [vmem:[%s760_s14 + $0x8] sm:$0xff] %vm391_vm5, %v388_v23 }
 0x2d0   :  { %v399_v24 = vpop.permute.xlu1 %398 }
 0x2d1   :  { %404 = vst.msk [vmem:[%s760_s14 + $0x8] sm:$0xff] %vm402_vm6, %v399_v24 }
 0x2d2   :  { %409 = vsyncpa [#allocation3], 1 }
 0x2d3   :  { %410 = vsyncpa [#allocation5], 1 }
 0x2d4   :  { %411 = vsyncpa [#allocation8], 1 }

</bundles_post_ra>
